<compile_context>
chip_gen: v7x
topology: tpu7x:2x2x1
jax: 0.10.0
libtpu: 0.0.40
codegen_flags: <defaults>
</compile_context>

<pallas_src>
import math
import functools

import jax
import jax.numpy as jnp
from jax.experimental import pallas as pl
from jax.experimental.pallas import tpu as pltpu


def _round_up(x: int, m: int) -> int:
    return ((x + m - 1) // m) * m


def _live_vmem_bytes(tm, tn, tk, num_expert, compute_bytes, out_bytes):
    """Approximate live VMEM: double-buffered x / weights / bias / out blocks,
    the f32 accumulator, and the f32 mixed-weight temporary."""
    return (2 * tm * tk * compute_bytes                      # x blocks
            + 2 * num_expert * tk * tn * compute_bytes       # weight blocks
            + 2 * tn * 4                                     # bias blocks
            + 2 * tm * tn * out_bytes                        # output blocks
            + tm * tn * 4                                    # f32 accumulator
            + tk * tn * 4)                                   # f32 mixed weight


def _choose_tiles(batch, in_features, out_features, num_expert,
                  compute_bytes=2, out_bytes=4):
    # tm covers the whole (padded) batch up to 512 rows -> weights are fetched
    # from HBM only once per (j, k) tile for moderate batch sizes.
    tm = min(512, _round_up(batch, 8))
    tn = min(512, _round_up(out_features, 128))
    tk = min(2048, _round_up(in_features, 128))

    # Budget live VMEM to ~36 MiB so the config also fits v7x (64 MiB physical).
    budget = 36 * 1024 * 1024
    while (_live_vmem_bytes(tm, tn, tk, num_expert, compute_bytes, out_bytes)
           > budget and tk > 128):
        tk = max(128, ((tk // 2) // 128) * 128)

    # v7x: 2 TensorCores are fed by the "parallel" grid axes -> try to expose
    # at least 2 parallel tiles.  No-op on tiny problems (and on v5e/v6e).
    bp_tiles = _round_up(batch, tm) // tm
    np_tiles = _round_up(out_features, tn) // tn
    if bp_tiles * np_tiles < 2:
        if out_features > 128 and tn > 128:
            tn = max(128, ((_round_up(out_features, 128) // 2) // 128) * 128)
        elif batch > 8 and tm > 8:
            tm = max(8, ((_round_up(batch, 8) // 2) // 8) * 8)
    return tm, tn, tk


def prepare_moe_weight(weight, *, tn, tk, compute_dtype=jnp.bfloat16):
    """One-time (model-init) layout prep: pad OUT/IN to the tile grid,
    transpose to (E, Kp, Np) for an NN matmul, cast to bf16."""
    num_expert, out_f, in_f = weight.shape
    Np = _round_up(out_f, tn)
    Kp = _round_up(in_f, tk)
    wp = jnp.pad(weight, ((0, 0), (0, Np - out_f), (0, Kp - in_f)))
    return jnp.transpose(wp, (0, 2, 1)).astype(compute_dtype)   # (E, Kp, Np)


def moe_classifier_kernel(gate_ref, x_ref, w_ref, b_ref, o_ref, acc_ref):
    """gate_ref: SMEM (E,) f32 gates (scalar prefetch)
    x_ref:   VMEM (tm, tk)  compute dtype (bf16)
    w_ref:   VMEM (E, tk, tn) compute dtype (bf16), already transposed (NN)
    b_ref:   VMEM (1, tn) f32, pre-mixed bias
    o_ref:   VMEM (tm, tn)
    acc_ref: VMEM (tm, tn) f32 scratch accumulator (resident across k)."""
    k = pl.program_id(2)
    num_expert = w_ref.shape[0]

    # Hoist gate SMEM reads once per invocation.
    gates = [gate_ref[e] for e in range(num_expert)]

    @pl.when(k == 0)
    def _init():
        acc_ref[...] = jnp.zeros_like(acc_ref)

    # VPU mix of the weight tile (f32), single bf16 MXU matmul per k step.
    w_mix = gates[0] * w_ref[0].astype(jnp.float32)
    for e in range(1, num_expert):
        w_mix = w_mix + gates[e] * w_ref[e].astype(jnp.float32)

    acc_ref[...] += jnp.dot(x_ref[...], w_mix.astype(x_ref.dtype),
                            preferred_element_type=jnp.float32)

    @pl.when(k == pl.num_programs(2) - 1)
    def _finish():
        o_ref[...] = (acc_ref[...] + b_ref[...]).astype(o_ref.dtype)


@functools.partial(jax.jit, static_argnames=("out_features", "tm", "tn", "tk"))
def moe_classifier(x, expert_weights, w_prepped, bias, *, out_features, tm, tn, tk):
    """x: (B, in_features); expert_weights: (E,);
    w_prepped: (E, Kp, Np) from prepare_moe_weight; bias: (E, out) or None.
    Returns (B, out_features)."""
    B, in_f = x.shape
    num_expert, Kp, Np = w_prepped.shape
    out_dtype = x.dtype
    compute_dtype = w_prepped.dtype

    Bp = _round_up(B, tm)
    xp = jnp.pad(x.astype(compute_dtype), ((0, Bp - B), (0, Kp - in_f)))

    gates = expert_weights.astype(jnp.float32)
    if bias is not None:
        mixed_b = gates @ bias.astype(jnp.float32)           # (out,)
    else:
        mixed_b = jnp.zeros((out_features,), jnp.float32)
    mixed_b = jnp.pad(mixed_b, (0, Np - out_features)).reshape(1, Np)

    grid = (Bp // tm, Np // tn, Kp // tk)

    compute_bytes = jnp.dtype(compute_dtype).itemsize
    out_bytes = jnp.dtype(out_dtype).itemsize
    live = _live_vmem_bytes(tm, tn, tk, num_expert, compute_bytes, out_bytes)
    vmem_limit = min(48 * 1024 * 1024,
                     max(32 * 1024 * 1024, int(1.25 * live)))

    batch_tiles = Bp // tm
    cost = pl.CostEstimate(
        flops=2 * Bp * Np * Kp + 2 * num_expert * Np * Kp * batch_tiles,
        transcendentals=0,
        bytes_accessed=(compute_bytes * (Bp * Kp
                                         + num_expert * Kp * Np * batch_tiles)
                        + 4 * Np + out_bytes * Bp * Np),
    )

    out_padded = pl.pallas_call(
        moe_classifier_kernel,
        out_shape=jax.ShapeDtypeStruct((Bp, Np), out_dtype),
        grid_spec=pltpu.PrefetchScalarGridSpec(
            num_scalar_prefetch=1,          # gates -> SMEM
            grid=grid,
            in_specs=[
                pl.BlockSpec((tm, tk), lambda i, j, k, g: (i, k)),            # x
                pl.BlockSpec((num_expert, tk, tn), lambda i, j, k, g: (0, k, j)),  # W (NN)
                pl.BlockSpec((1, tn), lambda i, j, k, g: (0, j)),             # mixed bias
            ],
            out_specs=pl.BlockSpec((tm, tn), lambda i, j, k, g: (i, j)),
            scratch_shapes=[pltpu.VMEM((tm, tn), jnp.float32)],
        ),
        compiler_params=pltpu.CompilerParams(
            dimension_semantics=("parallel", "parallel", "arbitrary"),
            vmem_limit_bytes=int(vmem_limit),
        ),
        cost_estimate=cost,
    )(gates, xp, w_prepped, mixed_b)

    return out_padded[:B, :out_features]


def init_params(key, num_expert, in_features, out_features, dtype=jnp.float32):
    """Synthetic init mirroring the PyTorch reset_parameters() bounds."""
    kw, kb = jax.random.split(key)
    fan_in = out_features * in_features      # torch fan_in for (E, out, in)
    bound = 1.0 / math.sqrt(fan_in)
    weight = jax.random.uniform(
        kw, (num_expert, out_features, in_features), dtype,
        minval=-bound, maxval=bound)
    bias = jax.random.uniform(
        kb, (num_expert, out_features), dtype, minval=-bound, maxval=bound)
    return weight, bias


def reference(x, expert_weights, weight, bias):
    mixed_w = jnp.sum(expert_weights[:, None, None] * weight, axis=0)
    mixed_b = jnp.sum(expert_weights[:, None] * bias, axis=0)
    return x @ mixed_w.T + mixed_b


if __name__ == "__main__":
    num_expert, in_features, out_features = 3, 32, 16
    batch = 4

    key = jax.random.PRNGKey(0)
    k_param, k_x, k_g = jax.random.split(key, 3)

    weight, bias = init_params(k_param, num_expert, in_features, out_features)
    x = jax.random.normal(k_x, (batch, in_features), jnp.float32)
    gates = jax.nn.softmax(jax.random.normal(k_g, (num_expert,), jnp.float32))

    # Tile selection + one-time weight layout prep (pad / transpose / bf16).
    tm, tn, tk = _choose_tiles(batch, in_features, out_features, num_expert)
    w_prepped = prepare_moe_weight(weight, tn=tn, tk=tk)

    out = moe_classifier(x, gates, w_prepped, bias,
                         out_features=out_features, tm=tm, tn=tn, tk=tk)
    out = jax.block_until_ready(out)

    ref = reference(x, gates, weight, bias)
    assert out.shape == (batch, out_features), out.shape
    # bf16 MXU path vs. f32 reference: loose tolerance.
    err = jnp.max(jnp.abs(out - ref))
    assert jnp.allclose(out, ref, atol=2e-2, rtol=2e-2), f"max abs err = {err}"

    print("KERNEL_OK")
</pallas_src>

<mosaic_0001>
module attributes {stable_mosaic.version = 11 : i64} {
  func.func @moe_classifier_kernel(%arg0: i32, %arg1: i32, %arg2: i32, %arg3: memref<3xf32, #tpu.memory_space<smem>>, %arg4: memref<8x128xbf16, #tpu.memory_space<vmem>>, %arg5: memref<3x128x128xbf16, #tpu.memory_space<vmem>>, %arg6: memref<1x128xf32, #tpu.memory_space<vmem>>, %arg7: memref<8x128xf32, #tpu.memory_space<vmem>>, %arg8: memref<8x128xf32, #tpu.memory_space<vmem>>) attributes {dimension_semantics = [#tpu.dimension_semantics<parallel>, #tpu.dimension_semantics<parallel>, #tpu.dimension_semantics<arbitrary>], iteration_bounds = array<i64: 1, 1, 1>, scalar_prefetch = 1 : i64, scratch_operands = 1 : i64, tpu.core_type = #tpu.core_type<tc>, window_params = [{transform_indices = @transform_0, window_bounds = array<i64: 8, 128>}, {transform_indices = @transform_1, window_bounds = array<i64: 3, 128, 128>}, {transform_indices = @transform_2, window_bounds = array<i64: 1, 128>}, {transform_indices = @transform_3, window_bounds = array<i64: 8, 128>}]} {
    %c0 = arith.constant 0 : index
    %0 = memref.load %arg3[%c0] : memref<3xf32, #tpu.memory_space<smem>>
    %c1 = arith.constant 1 : index
    %1 = memref.load %arg3[%c1] : memref<3xf32, #tpu.memory_space<smem>>
    %c2 = arith.constant 2 : index
    %2 = memref.load %arg3[%c2] : memref<3xf32, #tpu.memory_space<smem>>
    %c0_i32 = arith.constant 0 : i32
    %3 = arith.cmpi eq, %arg2, %c0_i32 : i32
    %4 = arith.extui %3 : i1 to i32
    %c0_i32_0 = arith.constant 0 : i32
    %5 = arith.cmpi ne, %4, %c0_i32_0 : i32
    scf.if %5 {
      %cst_18 = arith.constant 0.000000e+00 : f32
      %32 = vector.broadcast %cst_18 : f32 to vector<8x128xf32>
      %c0_19 = arith.constant 0 : index
      %c0_20 = arith.constant 0 : index
      %33 = vector.load %arg8[%c0_19, %c0_20] : memref<8x128xf32, #tpu.memory_space<vmem>>, vector<8x128xf32>
      tpu.vector_store %arg8[%c0_19, %c0_20], %32 {strides = array<i32>} : memref<8x128xf32, #tpu.memory_space<vmem>>, vector<8x128xf32>,
    } else {
    }
    %c0_1 = arith.constant 0 : index
    %c0_2 = arith.constant 0 : index
    %c0_3 = arith.constant 0 : index
    %6 = vector.load %arg5[%c0_1, %c0_2, %c0_3] : memref<3x128x128xbf16, #tpu.memory_space<vmem>>, vector<1x128x128xbf16>
    %7 = vector.shape_cast %6 : vector<1x128x128xbf16> to vector<128x128xbf16>
    %8 = arith.extf %7 : vector<128x128xbf16> to vector<128x128xf32>
    %9 = vector.broadcast %0 : f32 to vector<128x128xf32>
    %10 = arith.mulf %9, %8 : vector<128x128xf32>
    %c1_4 = arith.constant 1 : index
    %c0_5 = arith.constant 0 : index
    %c0_6 = arith.constant 0 : index
    %11 = vector.load %arg5[%c1_4, %c0_5, %c0_6] : memref<3x128x128xbf16, #tpu.memory_space<vmem>>, vector<1x128x128xbf16>
    %12 = vector.shape_cast %11 : vector<1x128x128xbf16> to vector<128x128xbf16>
    %13 = arith.extf %12 : vector<128x128xbf16> to vector<128x128xf32>
    %14 = vector.broadcast %1 : f32 to vector<128x128xf32>
    %15 = arith.mulf %14, %13 : vector<128x128xf32>
    %16 = arith.addf %10, %15 : vector<128x128xf32>
    %c2_7 = arith.constant 2 : index
    %c0_8 = arith.constant 0 : index
    %c0_9 = arith.constant 0 : index
    %17 = vector.load %arg5[%c2_7, %c0_8, %c0_9] : memref<3x128x128xbf16, #tpu.memory_space<vmem>>, vector<1x128x128xbf16>
    %18 = vector.shape_cast %17 : vector<1x128x128xbf16> to vector<128x128xbf16>
    %19 = arith.extf %18 : vector<128x128xbf16> to vector<128x128xf32>
    %20 = vector.broadcast %2 : f32 to vector<128x128xf32>
    %21 = arith.mulf %20, %19 : vector<128x128xf32>
    %22 = arith.addf %16, %21 : vector<128x128xf32>
    %c0_10 = arith.constant 0 : index
    %c0_11 = arith.constant 0 : index
    %23 = vector.load %arg8[%c0_10, %c0_11] : memref<8x128xf32, #tpu.memory_space<vmem>>, vector<8x128xf32>
    %c0_12 = arith.constant 0 : index
    %c0_13 = arith.constant 0 : index
    %24 = vector.load %arg4[%c0_12, %c0_13] : memref<8x128xbf16, #tpu.memory_space<vmem>>, vector<8x128xbf16>
    %25 = arith.truncf %22 : vector<128x128xf32> to vector<128x128xbf16>
    %cst = arith.constant dense<0.000000e+00> : vector<8x128xf32>
    %26 = tpu.matmul %24, %25, %cst {dimension_numbers = #tpu.dot_dimension_numbers<[1], [0], [0], [1], [0, 0, 1, 1], [], []>} : vector<8x128xbf16>, vector<128x128xbf16>, vector<8x128xf32> -> vector<8x128xf32>
    %27 = arith.addf %23, %26 : vector<8x128xf32>
    %c0_14 = arith.constant 0 : index
    %c0_15 = arith.constant 0 : index
    %28 = vector.load %arg8[%c0_14, %c0_15] : memref<8x128xf32, #tpu.memory_space<vmem>>, vector<8x128xf32>
    tpu.vector_store %arg8[%c0_14, %c0_15], %27 {strides = array<i32>} : memref<8x128xf32, #tpu.memory_space<vmem>>, vector<8x128xf32>,
    %c0_i32_16 = arith.constant 0 : i32
    %29 = arith.cmpi eq, %arg2, %c0_i32_16 : i32
    %30 = arith.extui %29 : i1 to i32
    %c0_i32_17 = arith.constant 0 : i32
    %31 = arith.cmpi ne, %30, %c0_i32_17 : i32
    scf.if %31 {
      %c0_18 = arith.constant 0 : index
      %c0_19 = arith.constant 0 : index
      %32 = vector.load %arg8[%c0_18, %c0_19] : memref<8x128xf32, #tpu.memory_space<vmem>>, vector<8x128xf32>
      %c0_20 = arith.constant 0 : index
      %c0_21 = arith.constant 0 : index
      %33 = vector.load %arg6[%c0_20, %c0_21] : memref<1x128xf32, #tpu.memory_space<vmem>>, vector<1x128xf32>
      %34 = vector.broadcast %33 : vector<1x128xf32> to vector<8x128xf32>
      %35 = arith.addf %32, %34 : vector<8x128xf32>
      %c0_22 = arith.constant 0 : index
      %c0_23 = arith.constant 0 : index
      %36 = vector.load %arg7[%c0_22, %c0_23] : memref<8x128xf32, #tpu.memory_space<vmem>>, vector<8x128xf32>
      tpu.vector_store %arg7[%c0_22, %c0_23], %35 {strides = array<i32>} : memref<8x128xf32, #tpu.memory_space<vmem>>, vector<8x128xf32>,
    } else {
    }
    return
  }
  func.func @transform_0(%arg0: i32, %arg1: i32, %arg2: i32, %arg3: memref<3xf32, #tpu.memory_space<smem>>) -> (i32, i32) {
    %c0_i32 = arith.constant 0 : i32
    return %arg0, %arg2 : i32, i32
  }
  func.func @transform_1(%arg0: i32, %arg1: i32, %arg2: i32, %arg3: memref<3xf32, #tpu.memory_space<smem>>) -> (i32, i32, i32) {
    %c0_i32 = arith.constant 0 : i32
    %c0_i32_0 = arith.constant 0 : i32
    return %c0_i32, %arg2, %arg1 : i32, i32, i32
  }
  func.func @transform_2(%arg0: i32, %arg1: i32, %arg2: i32, %arg3: memref<3xf32, #tpu.memory_space<smem>>) -> (i32, i32) {
    %c0_i32 = arith.constant 0 : i32
    %c0_i32_0 = arith.constant 0 : i32
    return %c0_i32, %arg1 : i32, i32
  }
  func.func @transform_3(%arg0: i32, %arg1: i32, %arg2: i32, %arg3: memref<3xf32, #tpu.memory_space<smem>>) -> (i32, i32) {
    %c0_i32 = arith.constant 0 : i32
    return %arg0, %arg1 : i32, i32
  }
}

</mosaic_0001>

<bundles_post_ra>
// kernel: moe_classifier.1
= control target key start
LH: loop header
LB: loop body
LE: loop exit
PB: predicated region body
PF: predicated region fallthrough
CT: control target
= control target key end

     0   :  { %s606_s0 = inlined_call_operand.vmem [shape: f32[3], index: 0, kind: input, shape index: {}]   ;;  %s607_s1 = inlined_call_operand.vmem [shape: bf16[8,128], index: 1, kind: input, shape index: {}]   ;;  %s608_s2 = inlined_call_operand.hbm [shape: bf16[3,128,128], index: 2, kind: input, shape index: {}]   ;;  %s609_s3 = inlined_call_operand.vmem [shape: f32[1,128], index: 3, kind: input, shape index: {}]   ;;  %s610_s4 = inlined_call_operand.vmem [shape: f32[8,128], index: 4, kind: output, shape index: {}]  }
   0x1   :  { %s9_s17 = sshll.u32 %s606_s0, 4  ;;  %s10_s17 = int_to_ptr.vmem [resolvable:$true] %s9_s17 }
   0x2   :  { %s450_s18 = scalar_lea.vmem %s10_s17, 16  ;;  %p455_p1 = scmp.lt.s32.totalorder %s10_s17, %s10_s17 }
   0x3   :  { %p451_p0 = scmp.ne.s32.totalorder %s10_s17, %s450_s18  ;;  %p456_p2 = scmp.lt.s32.totalorder %s450_s18, %s450_s18 }
   0x5   :  { %p457_p3 = por %p456_p2, %p455_p1 }
   0x7   :  { %p458_p4 = pnand %p457_p3, %p451_p0 }
   0x9   :  { %461 = shalt.err (!%p458_p4)  }
   0xa   :  { %s488_s19 = smov [#allocation4]  }
   0xb   :  { %12 = dma.vmem_to_smem %s10_s17, 16, %s488_s19, [#allocation3] }
   0xc   :  { %484 = dma.done.wait [#allocation3], 16 }
   0xd   :  { %485 = vsyncadd [#allocation3], 4294967280 }
   0xe   :  { %14 = sfence }
   0xf   :  { %15 = vsyncpa [#allocation6], 0  ;;  %s489_s20 = smov [#allocation5]   ;;  %s462_s0 = scalar_lea.hbm %s608_s2, 3072 }
  0x10   :  { %s23_s21 = sshll.u32 %s489_s20, 4  ;;  %p463_p5 = scmp.ne.s32.totalorder %s608_s2, %s462_s0  ;;  %s24_s21 = int_to_ptr.vmem [resolvable:$true] %s23_s21 }
  0x11   :  { %p466_p6 = scmp.lt.u32.totalorder %s462_s0, %s608_s2 }
  0x13   :  { %p468_p7 = pnand %p466_p6, %p463_p5 }
  0x15   :  { %471 = shalt.err (!%p468_p7)
}
  0x16   :  { %s472_s28 = scalar_lea.vmem %s24_s21, 3072  ;;  %p477_p9 = scmp.lt.s32.totalorder %s24_s21, %s24_s21 }
  0x17   :  { %p473_p8 = scmp.ne.s32.totalorder %s24_s21, %s472_s28  ;;  %p478_p10 = scmp.lt.s32.totalorder %s472_s28, %s472_s28 }
  0x19   :  { %p479_p11 = por %p478_p10, %p477_p9 }
  0x1b   :  { %p480_p12 = pnand %p479_p11, %p473_p8 }
  0x1d   :  { %483 = shalt.err (!%p480_p12)
}
  0x1e   :  { %s490_s29 = smov 64   ;;  %s491_s30 = smov 4  }
  0x1f   :  { %29 = dma.hbm_to_vmem [thread:$0]  %s608_s2, 3072, %s24_s21, [#allocation6], %s490_s29, %s490_s29, %s491_s30  }
  0x20   :  { %486 = dma.done.wait [#allocation6], 3072  }
  0x21   :  { %487 = vsyncadd [#allocation6], 4294964224  ;;  %v492_v0 = vmov 0.0   ;;  %s36_s7 = sld [smem:[#allocation4]]  ;;  %s295_s8 = sld [smem:[#allocation4 + $0x1]]  ;;  %vm493_vm0 = vmmov 0  }
  0x22   :  { %424 = vmatprep.subr.bf16.mxu0 %v492_v0  ;;  %440 = vmatprep.mubr.msk.bf16.mxu0 %vm493_vm0, %v492_v0  ;;  %s296_s9 = sld [smem:[#allocation4 + $0x2]]  ;;  %v299_v1 = vld [vmem:[#allocation5] sm:$0xff]   ;;  %v394_v10 = vld [vmem:[#allocation5 + $0x8] sm:$0xff]   ;;  %v395_v21 = vld [vmem:[#allocation5 + $0x10] sm:$0xff]  }
  0x23   :  { %v331_v3 = vld [vmem:[#allocation5 + $0x40] sm:$0xff]   ;;  %v300_v6 = vunpack.c.l.bf16 %v299_v1  ;;  %v301_v7 = vunpack.c.h.bf16 %v299_v1  ;;  %v304_v14 = vunpack.c.l.bf16 %v394_v10  ;;  %v401_v15 = vld [vmem:[#allocation5 + $0x48] sm:$0xff]   ;;  %v305_v24 = vunpack.c.h.bf16 %v394_v10  ;;  %v402_v34 = vld [vmem:[#allocation5 + $0x50] sm:$0xff]  }
  0x24   :  { %v363_v5 = vld [vmem:[#allocation5 + $0x80] sm:$0xff]   ;;  %v332_v8 = vunpack.c.l.bf16 %v331_v3  ;;  %v333_v9 = vunpack.c.h.bf16 %v331_v3  ;;  %v408_v20 = vld [vmem:[#allocation5 + $0x88] sm:$0xff]   ;;  %v336_v28 = vunpack.c.l.bf16 %v401_v15  ;;  %v337_v29 = vunpack.c.h.bf16 %v401_v15  ;;  %v409_v39 = vld [vmem:[#allocation5 + $0x90] sm:$0xff]  }
  0x25   :  { %v364_v11 = vunpack.c.l.bf16 %v363_v5  ;;  %v365_v12 = vunpack.c.h.bf16 %v363_v5  ;;  %v368_v31 = vunpack.c.l.bf16 %v408_v20  ;;  %v369_v32 = vunpack.c.h.bf16 %v408_v20  ;;  %v396_v44 = vld [vmem:[#allocation5 + $0x18] sm:$0xff]   ;;  %v397_v63 = vld [vmem:[#allocation5 + $0x20] sm:$0xff]  }
  0x26   :  { %v308_v33 = vunpack.c.l.bf16 %v395_v21  ;;  %v309_v42 = vunpack.c.h.bf16 %v395_v21  ;;  %v340_v48 = vunpack.c.l.bf16 %v402_v34  ;;  %v341_v50 = vunpack.c.h.bf16 %v402_v34  ;;  %v403_v53 = vld [vmem:[#allocation5 + $0x58] sm:$0xff]   ;;  %v411_v21 = vld [vmem:[#allocation5 + $0xa0] sm:$0xff]  }
  0x27   :  { %v536_v2 = vstv %s36_s7  ;;  %v538_v4 = vstv %s295_s8  ;;  %v372_v51 = vunpack.c.l.bf16 %v409_v39  ;;  %v373_v52 = vunpack.c.h.bf16 %v409_v39  ;;  %v410_v58 = vld [vmem:[#allocation5 + $0x98] sm:$0xff]  }
  0x28   :  { %v540_v13 = vstv %s296_s9  ;;  %v77_v16 = vmul.f32 %v300_v6, %v536_v2  ;;  %v78_v17 = vmul.f32 %v301_v7, %v536_v2  ;;  %v127_v18 = vmul.f32 %v332_v8, %v538_v4 }
  0x29   :  { %v128_v19 = vmul.f32 %v333_v9, %v538_v4  ;;  %v193_v22 = vmul.f32 %v364_v11, %v540_v13  ;;  %v194_v23 = vmul.f32 %v365_v12, %v540_v13  ;;  %v79_v25 = vmul.f32 %v304_v14, %v536_v2  ;;  %v404_v11 = vld [vmem:[#allocation5 + $0x60] sm:$0xff]  }
  0x2a   :  { %v143_v26 = vadd.f32 %v127_v18, %v77_v16  ;;  %v80_v30 = vmul.f32 %v305_v24, %v536_v2  ;;  %v129_v37 = vmul.f32 %v336_v28, %v538_v4  ;;  %v130_v38 = vmul.f32 %v337_v29, %v538_v4 }
  0x2b   :  { %v144_v27 = vadd.f32 %v128_v19, %v78_v17  ;;  %v195_v40 = vmul.f32 %v368_v31, %v540_v13  ;;  %v196_v41 = vmul.f32 %v369_v32, %v540_v13  ;;  %v81_v43 = vmul.f32 %v308_v33, %v536_v2  ;;  %v405_v31 = vld [vmem:[#allocation5 + $0x68] sm:$0xff]  }
  0x2c   :  { %v209_v35 = vadd.f32 %v193_v22, %v143_v26  ;;  %v145_v46 = vadd.f32 %v129_v37, %v79_v25  ;;  %v146_v47 = vadd.f32 %v130_v38, %v80_v30  ;;  %v82_v49 = vmul.f32 %v309_v42, %v536_v2  ;;  %v398_v26 = vld [vmem:[#allocation5 + $0x28] sm:$0xff]  }
  0x2d   :  { %v210_v36 = vadd.f32 %v194_v23, %v144_v27  ;;  %v131_v56 = vmul.f32 %v340_v48, %v538_v4  ;;  %v312_v57 = vunpack.c.l.bf16 %v396_v44  ;;  %v132_v59 = vmul.f32 %v341_v50, %v538_v4  ;;  %v406_v50 = vld [vmem:[#allocation5 + $0x70] sm:$0xff]  }
  0x2e   :  { %v211_v54 = vadd.f32 %v195_v40, %v145_v46  ;;  %v212_v55 = vadd.f32 %v196_v41, %v146_v47  ;;  %v197_v60 = vmul.f32 %v372_v51, %v540_v13  ;;  %v198_v61 = vmul.f32 %v373_v52, %v540_v13  ;;  %v412_v40 = vld [vmem:[#allocation5 + $0xa8] sm:$0xff]  }
  0x2f   :  { %v227_v45 = vpack.c.bf16 %v210_v36, %v209_v35  ;;  %v313_v62 = vunpack.c.h.bf16 %v396_v44  ;;  %v147_v3 = vadd.f32 %v131_v56, %v81_v43  ;;  %v83_v5 = vmul.f32 %v312_v57, %v536_v2 }
  0x30   :  { %v228_v1 = vpack.c.bf16 %v212_v55, %v211_v54  ;;  %v344_v6 = vunpack.c.l.bf16 %v403_v53  ;;  %v148_v7 = vadd.f32 %v132_v59, %v82_v49  ;;  %v345_v9 = vunpack.c.h.bf16 %v403_v53 }
  0x31   :  { %425 = vmatpush3.bf16.msra.mxu0 %v227_v45  ;;  %v84_v8 = vmul.f32 %v313_v62, %v536_v2  ;;  %v376_v10 = vunpack.c.l.bf16 %v410_v58  ;;  %v213_v12 = vadd.f32 %v197_v60, %v147_v3  ;;  %v377_v15 = vunpack.c.h.bf16 %v410_v58  ;;  %v399_v45 = vld [vmem:[#allocation5 + $0x30] sm:$0xff]  }
  0x32   :  { %426 = vmatprep.subr.bf16.mxu0 %v492_v0  ;;  %v133_v14 = vmul.f32 %v344_v6, %v538_v4  ;;  %v316_v16 = vunpack.c.l.bf16 %v397_v63  ;;  %v214_v17 = vadd.f32 %v198_v61, %v148_v7  ;;  %v134_v18 = vmul.f32 %v345_v9, %v538_v4 }
  0x33   :  { %v199_v19 = vmul.f32 %v376_v10, %v540_v13  ;;  %v317_v20 = vunpack.c.h.bf16 %v397_v63  ;;  %v200_v23 = vmul.f32 %v377_v15, %v540_v13  ;;  %v348_v25 = vunpack.c.l.bf16 %v404_v11  ;;  %v413_v63 = vld [vmem:[#allocation5 + $0xb0] sm:$0xff]  }
  0x34   :  { %v149_v22 = vadd.f32 %v133_v14, %v83_v5  ;;  %v85_v24 = vmul.f32 %v316_v16, %v536_v2  ;;  %v229_v27 = vpack.c.bf16 %v214_v17, %v213_v12  ;;  %v150_v28 = vadd.f32 %v134_v18, %v84_v8  ;;  %v407_v8 = vld [vmem:[#allocation5 + $0x78] sm:$0xff]  }
  0x35   :  { %427 = vmatpush3.bf16.msra.mxu0 %v228_v1  ;;  %v86_v29 = vmul.f32 %v317_v20, %v536_v2  ;;  %v349_v30 = vunpack.c.h.bf16 %v404_v11  ;;  %v135_v33 = vmul.f32 %v348_v25, %v538_v4  ;;  %v380_v34 = vunpack.c.l.bf16 %v411_v21  ;;  %v400_v1 = vld [vmem:[#allocation5 + $0x38] sm:$0xff]  }
  0x36   :  { %428 = vmatprep.subr.bf16.mxu0 %v492_v0  ;;  %v215_v32 = vadd.f32 %v199_v19, %v149_v22  ;;  %v381_v35 = vunpack.c.h.bf16 %v411_v21  ;;  %v216_v36 = vadd.f32 %v200_v23, %v150_v28  ;;  %v320_v38 = vunpack.c.l.bf16 %v398_v26  ;;  %v414_v22 = vld [vmem:[#allocation5 + $0xb8] sm:$0xff]  }
  0x37   :  { %v136_v37 = vmul.f32 %v349_v30, %v538_v4  ;;  %v321_v39 = vunpack.c.h.bf16 %v398_v26  ;;  %v151_v41 = vadd.f32 %v135_v33, %v85_v24  ;;  %v201_v42 = vmul.f32 %v380_v34, %v540_v13 }
  0x38   :  { %v202_v43 = vmul.f32 %v381_v35, %v540_v13  ;;  %v352_v44 = vunpack.c.l.bf16 %v405_v31  ;;  %v230_v46 = vpack.c.bf16 %v216_v36, %v215_v32  ;;  %v87_v48 = vmul.f32 %v320_v38, %v536_v2 }
  0x39   :  { %429 = vmatpush3.bf16.msra.mxu0 %v229_v27  ;;  %v152_v47 = vadd.f32 %v136_v37, %v86_v29  ;;  %v88_v49 = vmul.f32 %v321_v39, %v536_v2  ;;  %v217_v51 = vadd.f32 %v201_v42, %v151_v41  ;;  %v353_v52 = vunpack.c.h.bf16 %v405_v31 }
  0x3a   :  { %430 = vmatprep.subr.bf16.mxu0 %v492_v0  ;;  %v137_v53 = vmul.f32 %v352_v44, %v538_v4  ;;  %v384_v54 = vunpack.c.l.bf16 %v412_v40  ;;  %v385_v56 = vunpack.c.h.bf16 %v412_v40  ;;  %v324_v57 = vunpack.c.l.bf16 %v399_v45 }
  0x3b   :  { %v218_v55 = vadd.f32 %v202_v43, %v152_v47  ;;  %v325_v58 = vunpack.c.h.bf16 %v399_v45  ;;  %v138_v59 = vmul.f32 %v353_v52, %v538_v4  ;;  %v356_v62 = vunpack.c.l.bf16 %v406_v50  ;;  %v297_v43 = vld [vmem:[%s609_s3] ss:$0 sm:$0xff] }
  0x3c   :  { %v153_v60 = vadd.f32 %v137_v53, %v87_v48  ;;  %v203_v61 = vmul.f32 %v384_v54, %v540_v13  ;;  %v204_v5 = vmul.f32 %v385_v56, %v540_v13  ;;  %v89_v6 = vmul.f32 %v324_v57, %v536_v2 }
  0x3d   :  { %431 = vmatpush3.bf16.msra.mxu0 %v230_v46  ;;  %v231_v3 = vpack.c.bf16 %v218_v55, %v217_v51  ;;  %v90_v7 = vmul.f32 %v325_v58, %v536_v2  ;;  %v154_v9 = vadd.f32 %v138_v59, %v88_v49  ;;  %v357_v11 = vunpack.c.h.bf16 %v406_v50 }
  0x3e   :  { %432 = vmatprep.subr.bf16.mxu0 %v492_v0  ;;  %v219_v10 = vadd.f32 %v203_v61, %v153_v60  ;;  %v139_v12 = vmul.f32 %v356_v62, %v538_v4  ;;  %v388_v14 = vunpack.c.l.bf16 %v413_v63  ;;  %v389_v15 = vunpack.c.h.bf16 %v413_v63 }
  0x3f   :  { %v328_v16 = vunpack.c.l.bf16 %v400_v1  ;;  %v329_v17 = vunpack.c.h.bf16 %v400_v1  ;;  %v220_v18 = vadd.f32 %v204_v5, %v154_v9  ;;  %v140_v19 = vmul.f32 %v357_v11, %v538_v4 }
  0x40   :  { %v155_v20 = vadd.f32 %v139_v12, %v89_v6  ;;  %v360_v21 = vunpack.c.l.bf16 %v407_v8  ;;  %v205_v23 = vmul.f32 %v388_v14, %v540_v13  ;;  %v206_v24 = vmul.f32 %v389_v15, %v540_v13 }
  0x41   :  { %433 = vmatpush3.bf16.msra.mxu0 %v231_v3  ;;  %v91_v25 = vmul.f32 %v328_v16, %v536_v2  ;;  %v92_v26 = vmul.f32 %v329_v17, %v536_v2  ;;  %v232_v27 = vpack.c.bf16 %v220_v18, %v219_v10  ;;  %v156_v28 = vadd.f32 %v140_v19, %v90_v7 }
  0x42   :  { %434 = vmatprep.subr.bf16.mxu0 %v492_v0  ;;  %v361_v29 = vunpack.c.h.bf16 %v407_v8  ;;  %v141_v30 = vmul.f32 %v360_v21, %v538_v4  ;;  %v221_v31 = vadd.f32 %v205_v23, %v155_v20  ;;  %v392_v32 = vunpack.c.l.bf16 %v414_v22 }
  0x43   :  { %v393_v33 = vunpack.c.h.bf16 %v414_v22  ;;  %v222_v34 = vadd.f32 %v206_v24, %v156_v28 }
  0x44   :  { %v142_v35 = vmul.f32 %v361_v29, %v538_v4  ;;  %v157_v36 = vadd.f32 %v141_v30, %v91_v25  ;;  %v207_v37 = vmul.f32 %v392_v32, %v540_v13  ;;  %v226_v4 = vld [vmem:[%s607_s1] sm:$0xf] }
  0x45   :  { %435 = vmatpush3.bf16.msra.mxu0 %v232_v27  ;;  %v208_v38 = vmul.f32 %v393_v33, %v540_v13  ;;  %v233_v2 = vpack.c.bf16 %v222_v34, %v221_v31 }
  0x46   :  { %436 = vmatprep.subr.bf16.mxu0 %v492_v0  ;;  %v158_v39 = vadd.f32 %v142_v35, %v92_v26  ;;  %v223_v40 = vadd.f32 %v207_v37, %v157_v36 }
  0x48   :  { %v224_v41 = vadd.f32 %v208_v38, %v158_v39 }
  0x49   :  { %437 = vmatpush3.bf16.msra.mxu0 %v233_v2 }
  0x4a   :  { %438 = vmatprep.subr.bf16.mxu0 %v492_v0  ;;  %v234_v42 = vpack.c.bf16 %v224_v41, %v223_v40 }
  0x4d   :  { %439 = vmatpush3.bf16.msra.mxu0 %v234_v42 }
  0x50   :  { %441 = vmatmul.mubr.bf16.vlgmr.msra.gmra.mrb[0].mxu0 %v226_v4 }
 0x123   :  { %v269_v44 = vpop.f32.mrb[0].mxu0 }
 0x124   :  { %v288_v13 = vadd.f32 %v297_v43, %v269_v44  ;;  %v442_v45 = vpop.f32.mrb[1].mxu0 }
 0x125   :  { %v272_v46 = vpop.f32.mrb[2].mxu0 }
 0x126   :  { %289 = vst [vmem:[%s610_s4] sm:$0xff] %v288_v13  ;;  %v443_v0 = vpop.f32.mrb[3].mxu0 }
 0x127   :  { %294 = vsyncpa [#allocation6], 1 }

</bundles_post_ra>
